<compile_context>
chip_gen: v7x
topology: tpu7x:2x2x1
jax: 0.10.0
libtpu: 0.0.40
codegen_flags: <defaults>
</compile_context>

<pallas_src>
import functools
import math

import numpy as np
import jax
import jax.numpy as jnp
from jax import lax
from jax.experimental import pallas as pl
from jax.experimental.pallas import tpu as pltpu


@functools.lru_cache(maxsize=None)
def _vmem_limit():
    # 48 MiB is safe on every generation (v7x has 64 MiB physical per core);
    # raise towards 96 MiB on chips with 128 MiB VMEM (v5e/v6e) when queryable.
    try:
        cap = int(pltpu.get_tpu_info().vmem_capacity_bytes)
    except Exception:
        cap = 0
    if cap >= 64 * 1024 * 1024:
        return int(min(96 * 1024 * 1024, cap * 3 // 4))
    return 48 * 1024 * 1024


def _pad2(a, shape):
    pads = [(0, t - s) for s, t in zip(a.shape, shape)]
    if any(p[1] > 0 for p in pads):
        a = jnp.pad(a, pads)
    return a


# -----------------------------------------------------------------------------
# Kernel 1 (fused stats): single lane-dense pass over x (M, D) accumulating
#   xsum  (1, D)            column sums of x
#   gram  (chunk, chunk)    sum over 128-lane-aligned chunks of xc^T xc
# Per-(block,block) group Grams are recovered in the glue by summing the
# diagonal sub-blocks, so the kernel never slices at non-128-aligned lanes and
# every matmul is a full-width MXU op.  Grams accumulate straight into the
# VMEM-resident output ref (flat vreg pressure for block >= 128).
# -----------------------------------------------------------------------------
def _stats_kernel(x_ref, xsum_ref, gram_ref, *, chunk, n_chunks, rows_total, tm,
                  tiles_per_shard, need_mask):
    s = pl.program_id(0)
    t = pl.program_id(1)

    @pl.when(t == 0)
    def _():
        xsum_ref[...] = jnp.zeros_like(xsum_ref)
        gram_ref[...] = jnp.zeros_like(gram_ref)

    xt = x_ref[...]                                       # (tm, D) lane-dense load
    if need_mask:                                         # tail rows -> exact zeros
        row0 = (s * tiles_per_shard + t) * tm
        rid = lax.broadcasted_iota(jnp.int32, (xt.shape[0], 1), 0)
        xt = jnp.where(rid + row0 < rows_total, xt, jnp.zeros((), xt.dtype))

    xsum_ref[...] += jnp.sum(xt.astype(jnp.float32), axis=0, keepdims=True)[None]
    for c in range(n_chunks):                             # static unroll, aligned slices
        xc = xt[:, c * chunk:(c + 1) * chunk]
        gram_ref[...] += lax.dot_general(
            xc, xc, (((0,), (0,)), ((), ())),
            preferred_element_type=jnp.float32)[None]


def column_stats(x2d, block):
    """Returns (per-block column sums (block,), X^T X (block, block)) for
    X = x2d.reshape(-1, block), streaming x2d from HBM exactly once."""
    M, D = x2d.shape
    assert D % block == 0, "in_features must be divisible by block"
    G = D // block

    # Lane-aligned Gram chunk: 128-wide whenever the group structure allows it.
    if block % 128 == 0:
        chunk = block
    elif (128 % block == 0) and (D % 128 == 0):
        chunk = 128
    else:
        chunk = block                                     # odd/tiny shapes: correctness path
    n_chunks = D // chunk

    # Row-tile size from the actual dtype and a 16 MiB double-buffer budget.
    itemsize = jnp.dtype(x2d.dtype).itemsize
    budget = 16 * 1024 * 1024
    tm = max(8, (budget // (2 * D * itemsize)) // 8 * 8)
    if tm >= M:
        tm = M
    ntiles = pl.cdiv(M, tm)

    # Shard the row loop across TensorCores when it splits evenly (v7x megacore);
    # each shard accumulates into its own output slot, summed in the glue below.
    n_shards = 2 if (ntiles % 2 == 0 and ntiles >= 2 and chunk % 8 == 0) else 1
    tiles_per_shard = ntiles // n_shards
    need_mask = (ntiles * tm != M)

    xsum, gram = pl.pallas_call(
        functools.partial(_stats_kernel, chunk=chunk, n_chunks=n_chunks,
                          rows_total=M, tm=tm, tiles_per_shard=tiles_per_shard,
                          need_mask=need_mask),
        out_shape=(jax.ShapeDtypeStruct((n_shards, 1, D), jnp.float32),
                   jax.ShapeDtypeStruct((n_shards, chunk, chunk), jnp.float32)),
        grid_spec=pltpu.PrefetchScalarGridSpec(
            num_scalar_prefetch=0,
            grid=(n_shards, tiles_per_shard),
            in_specs=[pl.BlockSpec((tm, D),
                                   lambda s, t: (s * tiles_per_shard + t, 0))],
            out_specs=[pl.BlockSpec((1, 1, D), lambda s, t: (s, 0, 0)),
                       pl.BlockSpec((1, chunk, chunk), lambda s, t: (s, 0, 0))],
        ),
        compiler_params=pltpu.CompilerParams(
            dimension_semantics=("parallel", "arbitrary"),
            vmem_limit_bytes=_vmem_limit()),
    )(x2d)

    colsum = jnp.sum(xsum.reshape(n_shards, D), axis=0)          # (D,)
    gram_all = jnp.sum(gram, axis=0)                             # (chunk, chunk)

    # Fold chunk Gram back to (block, block): sum of diagonal sub-blocks.
    n_sub = chunk // block
    if n_sub > 1:
        g4 = gram_all.reshape(n_sub, block, n_sub, block)
        gram_block = g4[0, :, 0, :]
        for i in range(1, n_sub):
            gram_block = gram_block + g4[i, :, i, :]
    else:
        gram_block = gram_all
    group_sum = colsum.reshape(G, block).sum(axis=0)             # (block,)
    return group_sum, gram_block


# -----------------------------------------------------------------------------
# Kernel 2: Newton-Schulz inverse matrix square root (matches
#           isqrt_newton_schulz_autograd).  Statically unrolled (n_iter small).
# -----------------------------------------------------------------------------
def _isqrt_ns_kernel(a_ref, o_ref, *, n_iter):
    A = a_ref[...].astype(jnp.float32)
    normA = jnp.sqrt(jnp.sum(A * A))                             # Frobenius norm
    eye = jnp.eye(A.shape[0], dtype=jnp.float32)
    Y = A / normA
    Z = eye
    for _ in range(n_iter):                                      # static unroll
        T = 0.5 * (3.0 * eye - jnp.dot(Z, Y, preferred_element_type=jnp.float32))
        Y = jnp.dot(Y, T, preferred_element_type=jnp.float32)
        Z = jnp.dot(T, Z, preferred_element_type=jnp.float32)
    o_ref[...] = Z / jnp.sqrt(normA)


def isqrt_newton_schulz(cov, n_iter):
    d = cov.shape[0]
    return pl.pallas_call(
        functools.partial(_isqrt_ns_kernel, n_iter=n_iter),
        out_shape=jax.ShapeDtypeStruct((d, d), jnp.float32),
    )(cov.astype(jnp.float32))


# -----------------------------------------------------------------------------
# Kernel 3: plain tiled linear  y = x @ w_adj^T + b  (whitened weight is
# precomputed in XLA, so the MXU only runs the M*N*K matmul in the compute
# dtype with f32 accumulation).  K tail is masked in-kernel; the small w/bias
# operands are zero-padded in the wrapper instead of copying x.
# -----------------------------------------------------------------------------
def _linear_kernel(x_ref, w_ref, b_ref, o_ref, acc_ref, *, k_total, mask_k):
    k = pl.program_id(2)
    nk = pl.num_programs(2)

    @pl.when(k == 0)
    def _():
        acc_ref[...] = jnp.zeros_like(acc_ref)

    xk = x_ref[...]
    if mask_k:                                                   # zero OOB K columns
        tk = xk.shape[1]
        col = lax.broadcasted_iota(jnp.int32, (1, tk), 1)
        limit = jnp.minimum(k_total - k * tk, tk)
        xk = jnp.where(col < limit, xk, jnp.zeros((), xk.dtype))
    if xk.dtype != w_ref.dtype:
        xk = xk.astype(w_ref.dtype)                              # in-kernel cast (no HBM copy)

    acc_ref[...] += lax.dot_general(
        xk, w_ref[...], (((1,), (1,)), ((), ())),
        preferred_element_type=jnp.float32)

    @pl.when(k == nk - 1)
    def _():
        o_ref[...] = (acc_ref[...] + b_ref[...]).astype(o_ref.dtype)


def tiled_linear(x2d, w_adj, bias_vec, *, compute_dtype=jnp.bfloat16,
                 tile_m=512, tile_n=512, tile_k=1024):
    M, K = x2d.shape
    N = w_adj.shape[0]

    Np = 128 if N < 128 else N                 # lane-dense stores for tiny out_features
    tm = M if M <= tile_m else tile_m          # tile_m multiple of 8
    tn = Np if Np <= tile_n else tile_n        # tile_n multiple of 128
    tk = K if K <= tile_k else tile_k          # tile_k multiple of 128
    nk = pl.cdiv(K, tk)
    Kp = nk * tk
    mask_k = (Kp != K)

    # Pad/cast only the SMALL operands; x stays untouched in HBM.
    w = _pad2(w_adj.astype(compute_dtype), (Np, Kp))
    b = _pad2(bias_vec.reshape(1, N).astype(jnp.float32), (1, Np))

    # x is re-streamed Np//tn times; a bf16 pre-cast copy only pays off when
    # it is re-read often (perf-review: avoid wrapper-side copies of x).
    n_reads = pl.cdiv(Np, tn)
    if x2d.dtype != compute_dtype and n_reads > 3:
        x_in = x2d.astype(compute_dtype)
    else:
        x_in = x2d

    out = pl.pallas_call(
        functools.partial(_linear_kernel, k_total=K, mask_k=mask_k),
        out_shape=jax.ShapeDtypeStruct((M, Np), x2d.dtype),
        grid_spec=pltpu.PrefetchScalarGridSpec(
            num_scalar_prefetch=0,
            grid=(pl.cdiv(M, tm), pl.cdiv(Np, tn), nk),
            in_specs=[
                pl.BlockSpec((tm, tk), lambda i, j, k: (i, k)),
                pl.BlockSpec((tn, tk), lambda i, j, k: (j, k)),
                pl.BlockSpec((1, tn), lambda i, j, k: (0, j)),
            ],
            out_specs=pl.BlockSpec((tm, tn), lambda i, j, k: (i, j)),
            scratch_shapes=[pltpu.VMEM((tm, tn), jnp.float32)],
        ),
        compiler_params=pltpu.CompilerParams(
            dimension_semantics=("parallel", "parallel", "arbitrary"),
            vmem_limit_bytes=_vmem_limit()),
    )(x_in, w, b)
    return out[:, :N] if Np != N else out


# -----------------------------------------------------------------------------
# Delinear forward (training mode = module default right after __init__)
# -----------------------------------------------------------------------------
def delinear_forward(x, weight, bias, *, block, eps=1e-5, n_iter=5, momentum=0.1,
                     running_mean=None, running_deconv=None, training=True,
                     compute_dtype=jnp.bfloat16):
    out_features, in_features = weight.shape
    G = in_features // block
    x2d = x.reshape(-1, in_features)
    M = x2d.shape[0]

    if training:
        group_sum, gram_block = column_stats(x2d, block)   # ONE pass over x (Pallas)
        rows = M * G                                        # rows of X = x.view(-1, block)
        mean_vec = group_sum * (1.0 / rows)                 # (block,)
        # TODO(synk): single-pass E[xx^T]-mu mu^T can lose precision when the
        # per-column mean is large vs std; switch to compensated accumulation
        # if drift is observed during training.
        cov = (gram_block * (1.0 / rows)
               - jnp.outer(mean_vec, mean_vec)
               + eps * jnp.eye(block, dtype=jnp.float32))
        deconv = isqrt_newton_schulz(cov, n_iter)           # Pallas Newton-Schulz
        # functional equivalent of the in-place running-buffer updates
        new_rm = (1.0 - momentum) * running_mean + momentum * mean_vec
        new_rd = (1.0 - momentum) * running_deconv + momentum * deconv
    else:
        mean_vec = running_mean
        deconv = running_deconv
        new_rm, new_rd = running_mean, running_deconv

    # Whitened weight precomputed ONCE in XLA (N*K*block MACs, tiny vs the main
    # matmul); previously this was redundantly recomputed for every M-tile
    # inside the linear kernel and dominated its runtime.
    w_blocks = weight.reshape(-1, block).astype(jnp.float32) @ deconv  # (N*G, block)
    w_adj = w_blocks.reshape(out_features, in_features)
    comp = (w_blocks @ mean_vec).reshape(out_features, G).sum(axis=1)
    b = -comp if bias is None else bias - comp

    y2d = tiled_linear(x2d, w_adj, b, compute_dtype=compute_dtype)
    y = y2d.reshape(x.shape[:-1] + (out_features,))
    return y, (new_rm, new_rd)


# -----------------------------------------------------------------------------
# Pure-JAX reference (mirrors the PyTorch math) for correctness checking.
# -----------------------------------------------------------------------------
def delinear_reference(x, weight, bias, block, eps, n_iter):
    out_features, in_features = weight.shape
    X = x.reshape(-1, block)
    X_mean = X.mean(0)
    Xc = X - X_mean[None, :]
    Id = jnp.eye(block, dtype=jnp.float32)
    Cov = eps * Id + (1.0 / X.shape[0]) * (Xc.T @ Xc)
    normA = jnp.sqrt(jnp.sum(Cov * Cov))
    Y = Cov / normA
    Z = Id
    for _ in range(n_iter):
        T = 0.5 * (3.0 * Id - Z @ Y)
        Y = Y @ T
        Z = T @ Z
    deconv = Z / jnp.sqrt(normA)
    w = weight.reshape(-1, block) @ deconv
    b = bias - (w @ X_mean[:, None]).reshape(out_features, -1).sum(1)
    w = w.reshape(out_features, in_features)
    y2d = x.reshape(-1, in_features) @ w.T + b
    return y2d.reshape(x.shape[:-1] + (out_features,))


if __name__ == "__main__":
    # Small shapes consistent with the module: x (..., in_features), block | in_features.
    batch, seq = 2, 16
    in_features, out_features, block = 64, 16, 32            # G = 2
    eps, n_iter, momentum = 1e-5, 5, 0.1

    key = jax.random.PRNGKey(0)
    kx, kw, kb = jax.random.split(key, 3)
    bound = 1.0 / math.sqrt(in_features)
    weight = jax.random.uniform(kw, (out_features, in_features), jnp.float32, -bound, bound)
    bias = jax.random.uniform(kb, (out_features,), jnp.float32, -bound, bound)
    x = jax.random.normal(kx, (batch, seq, in_features), jnp.float32)

    running_mean = jnp.zeros((block,), jnp.float32)
    running_deconv = jnp.eye(block, dtype=jnp.float32)

    y_ref = jax.block_until_ready(delinear_reference(x, weight, bias, block, eps, n_iter))

    # f32 compute path: tight check against the reference.
    y32, (new_rm, new_rd) = delinear_forward(
        x, weight, bias, block=block, eps=eps, n_iter=n_iter, momentum=momentum,
        running_mean=running_mean, running_deconv=running_deconv, training=True,
        compute_dtype=jnp.float32)
    y32 = jax.block_until_ready(y32)
    np.testing.assert_allclose(np.array(y32), np.array(y_ref), rtol=2e-3, atol=2e-3)

    # bf16 compute path (MXU-native) for the main x @ w_adj^T matmul, f32 accumulation.
    ybf, _ = delinear_forward(
        x, weight, bias, block=block, eps=eps, n_iter=n_iter, momentum=momentum,
        running_mean=running_mean, running_deconv=running_deconv, training=True,
        compute_dtype=jnp.bfloat16)
    ybf = jax.block_until_ready(ybf)
    np.testing.assert_allclose(np.array(ybf), np.array(y_ref), rtol=2e-2, atol=2e-2)

    assert y32.shape == (batch, seq, out_features)
    assert new_rm.shape == (block,) and new_rd.shape == (block, block)
    print("KERNEL_OK")
</pallas_src>

<mosaic_0001>
module attributes {stable_mosaic.version = 11 : i64} {
  func.func @_stats_kernel(%arg0: i32, %arg1: i32, %arg2: memref<32x64xf32, #tpu.memory_space<vmem>>, %arg3: memref<1x1x64xf32, #tpu.memory_space<vmem>>, %arg4: memref<1x32x32xf32, #tpu.memory_space<vmem>>) attributes {dimension_semantics = [#tpu.dimension_semantics<parallel>, #tpu.dimension_semantics<arbitrary>], iteration_bounds = array<i64: 1, 1>, scalar_prefetch = 0 : i64, scratch_operands = 0 : i64, tpu.core_type = #tpu.core_type<tc>, window_params = [{transform_indices = @transform_0, window_bounds = array<i64: 32, 64>}, {transform_indices = @transform_1, window_bounds = array<i64: 1, 1, 64>}, {transform_indices = @transform_2, window_bounds = array<i64: 1, 32, 32>}]} {
    %c0_i32 = arith.constant 0 : i32
    %0 = arith.cmpi eq, %arg1, %c0_i32 : i32
    %1 = arith.extui %0 : i1 to i32
    %c0_i32_0 = arith.constant 0 : i32
    %2 = arith.cmpi ne, %1, %c0_i32_0 : i32
    scf.if %2 {
      %cst_22 = arith.constant 0.000000e+00 : f32
      %22 = vector.broadcast %cst_22 : f32 to vector<1x1x64xf32>
      %c0_23 = arith.constant 0 : index
      %c0_24 = arith.constant 0 : index
      %c0_25 = arith.constant 0 : index
      %23 = vector.load %arg3[%c0_23, %c0_24, %c0_25] : memref<1x1x64xf32, #tpu.memory_space<vmem>>, vector<1x1x64xf32>
      tpu.vector_store %arg3[%c0_23, %c0_24, %c0_25], %22 {strides = array<i32>} : memref<1x1x64xf32, #tpu.memory_space<vmem>>, vector<1x1x64xf32>,
      %cst_26 = arith.constant 0.000000e+00 : f32
      %24 = vector.broadcast %cst_26 : f32 to vector<1x32x32xf32>
      %c0_27 = arith.constant 0 : index
      %c0_28 = arith.constant 0 : index
      %c0_29 = arith.constant 0 : index
      %25 = vector.load %arg4[%c0_27, %c0_28, %c0_29] : memref<1x32x32xf32, #tpu.memory_space<vmem>>, vector<1x32x32xf32>
      tpu.vector_store %arg4[%c0_27, %c0_28, %c0_29], %24 {strides = array<i32>} : memref<1x32x32xf32, #tpu.memory_space<vmem>>, vector<1x32x32xf32>,
    } else {
    }
    %c0 = arith.constant 0 : index
    %c0_1 = arith.constant 0 : index
    %3 = vector.load %arg2[%c0, %c0_1] : memref<32x64xf32, #tpu.memory_space<vmem>>, vector<32x64xf32>
    %c0_2 = arith.constant 0 : index
    %c0_3 = arith.constant 0 : index
    %c0_4 = arith.constant 0 : index
    %4 = vector.load %arg3[%c0_2, %c0_3, %c0_4] : memref<1x1x64xf32, #tpu.memory_space<vmem>>, vector<1x1x64xf32>
    %cst = arith.constant dense<0.000000e+00> : vector<64xf32>
    %5 = vector.multi_reduction <add>, %3, %cst [0] : vector<32x64xf32> to vector<64xf32>
    %6 = vector.shape_cast %5 : vector<64xf32> to vector<1x64xf32>
    %7 = vector.shape_cast %6 : vector<1x64xf32> to vector<1x1x64xf32>
    %8 = arith.addf %4, %7 : vector<1x1x64xf32>
    %c0_5 = arith.constant 0 : index
    %c0_6 = arith.constant 0 : index
    %c0_7 = arith.constant 0 : index
    %9 = vector.load %arg3[%c0_5, %c0_6, %c0_7] : memref<1x1x64xf32, #tpu.memory_space<vmem>>, vector<1x1x64xf32>
    tpu.vector_store %arg3[%c0_5, %c0_6, %c0_7], %8 {strides = array<i32>} : memref<1x1x64xf32, #tpu.memory_space<vmem>>, vector<1x1x64xf32>,
    %10 = vector.extract_strided_slice %3 {offsets = [0, 0], sizes = [32, 32], strides = [1, 1]} : vector<32x64xf32> to vector<32x32xf32>
    %c0_8 = arith.constant 0 : index
    %c0_9 = arith.constant 0 : index
    %c0_10 = arith.constant 0 : index
    %11 = vector.load %arg4[%c0_8, %c0_9, %c0_10] : memref<1x32x32xf32, #tpu.memory_space<vmem>>, vector<1x32x32xf32>
    %cst_11 = arith.constant dense<0.000000e+00> : vector<32x32xf32>
    %12 = tpu.matmul %10, %10, %cst_11 {dimension_numbers = #tpu.dot_dimension_numbers<[0], [0], [1], [1], [0, 1, 1, 1], [], []>} : vector<32x32xf32>, vector<32x32xf32>, vector<32x32xf32> -> vector<32x32xf32>
    %13 = vector.shape_cast %12 : vector<32x32xf32> to vector<1x32x32xf32>
    %14 = arith.addf %11, %13 : vector<1x32x32xf32>
    %c0_12 = arith.constant 0 : index
    %c0_13 = arith.constant 0 : index
    %c0_14 = arith.constant 0 : index
    %15 = vector.load %arg4[%c0_12, %c0_13, %c0_14] : memref<1x32x32xf32, #tpu.memory_space<vmem>>, vector<1x32x32xf32>
    tpu.vector_store %arg4[%c0_12, %c0_13, %c0_14], %14 {strides = array<i32>} : memref<1x32x32xf32, #tpu.memory_space<vmem>>, vector<1x32x32xf32>,
    %16 = vector.extract_strided_slice %3 {offsets = [0, 32], sizes = [32, 32], strides = [1, 1]} : vector<32x64xf32> to vector<32x32xf32>
    %c0_15 = arith.constant 0 : index
    %c0_16 = arith.constant 0 : index
    %c0_17 = arith.constant 0 : index
    %17 = vector.load %arg4[%c0_15, %c0_16, %c0_17] : memref<1x32x32xf32, #tpu.memory_space<vmem>>, vector<1x32x32xf32>
    %cst_18 = arith.constant dense<0.000000e+00> : vector<32x32xf32>
    %18 = tpu.matmul %16, %16, %cst_18 {dimension_numbers = #tpu.dot_dimension_numbers<[0], [0], [1], [1], [0, 1, 1, 1], [], []>} : vector<32x32xf32>, vector<32x32xf32>, vector<32x32xf32> -> vector<32x32xf32>
    %19 = vector.shape_cast %18 : vector<32x32xf32> to vector<1x32x32xf32>
    %20 = arith.addf %17, %19 : vector<1x32x32xf32>
    %c0_19 = arith.constant 0 : index
    %c0_20 = arith.constant 0 : index
    %c0_21 = arith.constant 0 : index
    %21 = vector.load %arg4[%c0_19, %c0_20, %c0_21] : memref<1x32x32xf32, #tpu.memory_space<vmem>>, vector<1x32x32xf32>
    tpu.vector_store %arg4[%c0_19, %c0_20, %c0_21], %20 {strides = array<i32>} : memref<1x32x32xf32, #tpu.memory_space<vmem>>, vector<1x32x32xf32>,
    return
  }
  func.func @transform_0(%arg0: i32, %arg1: i32) -> (i32, i32) {
    %c1_i32 = arith.constant 1 : i32
    %0 = arith.muli %arg0, %c1_i32 : i32
    %1 = arith.addi %0, %arg1 : i32
    %c0_i32 = arith.constant 0 : i32
    %c0_i32_0 = arith.constant 0 : i32
    return %1, %c0_i32 : i32, i32
  }
  func.func @transform_1(%arg0: i32, %arg1: i32) -> (i32, i32, i32) {
    %c0_i32 = arith.constant 0 : i32
    %c0_i32_0 = arith.constant 0 : i32
    %c0_i32_1 = arith.constant 0 : i32
    return %arg0, %c0_i32, %c0_i32_0 : i32, i32, i32
  }
  func.func @transform_2(%arg0: i32, %arg1: i32) -> (i32, i32, i32) {
    %c0_i32 = arith.constant 0 : i32
    %c0_i32_0 = arith.constant 0 : i32
    %c0_i32_1 = arith.constant 0 : i32
    return %arg0, %c0_i32, %c0_i32_0 : i32, i32, i32
  }
}

</mosaic_0001>

<bundles_post_ra>
// kernel: tpu_custom_call.1
= control target key start
LH: loop header
LB: loop body
LE: loop exit
PB: predicated region body
PF: predicated region fallthrough
CT: control target
= control target key end

     0   :  { %8 = vsyncpa [#allocation3], 0  ;;  %s626_s0 = inlined_call_operand.hbm [shape: f32[32,64], index: 0, kind: input, shape index: {}]   ;;  %s627_s1 = inlined_call_operand.hbm [shape: f32[1,1,64], index: 1, kind: output, shape index: {0}]   ;;  %s628_s2 = inlined_call_operand.hbm [shape: f32[1,32,32], index: 2, kind: output, shape index: {1}]  }
   0x1   :  { %9 = vsyncpa [#allocation4], 0 }
   0x2   :  { %10 = vsyncpa [#allocation7], 0  ;;  %s542_s9 = smov [#allocation2]   ;;  %s470_s13 = scalar_lea.hbm %s626_s0, 512 }
   0x3   :  { %s20_s10 = sshll.u32 %s542_s9, 4  ;;  %p471_p0 = scmp.ne.s32.totalorder %s626_s0, %s470_s13  ;;  %s21_s10 = int_to_ptr.vmem [resolvable:$true] %s20_s10 }
   0x4   :  { %p474_p1 = scmp.lt.u32.totalorder %s470_s13, %s626_s0 }
   0x6   :  { %p476_p2 = pnand %p474_p1, %p471_p0 }
   0x8   :  { %479 = shalt.err (!%p476_p2)
}
   0x9   :  { %s480_s18 = scalar_lea.vmem %s21_s10, 512  ;;  %p485_p4 = scmp.lt.s32.totalorder %s21_s10, %s21_s10 }
   0xa   :  { %p481_p3 = scmp.ne.s32.totalorder %s21_s10, %s480_s18  ;;  %p486_p5 = scmp.lt.s32.totalorder %s480_s18, %s480_s18 }
   0xc   :  { %p487_p6 = por %p486_p5, %p485_p4 }
   0xe   :  { %p488_p7 = pnand %p487_p6, %p481_p3 }
  0x10   :  { %491 = shalt.err (!%p488_p7)
}
  0x11   :  { %s543_s19 = smov 128   ;;  %s544_s20 = smov 8  }
  0x12   :  { %26 = dma.hbm_to_vmem [thread:$0]  %s626_s0, 512, %s21_s10, [#allocation3], %s543_s19, %s543_s19, %s544_s20  }
  0x13   :  { %536 = dma.done.wait [#allocation3], 512  }
  0x14   :  { %537 = vsyncadd [#allocation3], 4294966784  ;;  %vm48_vm0 = vcmask 523264   ;;  %v43_v0 = vld [vmem:[#allocation2] sm:$0xff]  ;;  %v45_v1 = vld [vmem:[#allocation2 + $0x10] sm:$0xff]  ;;  %s545_s23 = smov 96  }
  0x15   :  { %v44_v2 = vld [vmem:[#allocation2 + $0x8] sm:$0xff]  ;;  %215 = vrot.lane.b32.xlu0 %v43_v0, %s545_s23  ;;  %v49_v3 = vsel %vm48_vm0, %v43_v0, 0.0  ;;  %219 = vrot.lane.b32.xlu1 %v45_v1, %s545_s23  ;;  %v52_v4 = vsel %vm48_vm0, %v45_v1, 0.0  ;;  %v46_v8 = vld [vmem:[#allocation2 + $0x18] sm:$0xff]  ;;  %vm38_vm1 = vcmask 261120   ;;  %v546_v19 = vmov 0.0  }
  0x16   :  { %v50_v5 = vsel %vm48_vm0, %v44_v2, 0.0  ;;  %v447_v6 = vpack.c.bf16 %v44_v2, %v43_v0  ;;  %v54_v9 = vsel %vm48_vm0, %v46_v8, 0.0  ;;  %v451_v12 = vpack.c.bf16 %v46_v8, %v45_v1  ;;  %40 = vst.msk [vmem:[#allocation6 + $0x8] sm:$0xff] %vm38_vm1, %v546_v19  ;;  %39 = vst.msk [vmem:[#allocation6] sm:$0xff] %vm38_vm1, %v546_v19  ;;  %s547_s0 = smov [#allocation5]  }
  0x17   :  { %v51_v7 = vadd.f32 %v50_v5, %v49_v3  ;;  %41 = vst.msk [vmem:[#allocation6 + $0x10] sm:$0xff] %vm38_vm1, %v546_v19  ;;  %42 = vst.msk [vmem:[#allocation6 + $0x18] sm:$0xff] %vm38_vm1, %v546_v19  ;;  %vm36_vm2 = vcmask 516096   ;;  %s370_s24 = sshll.u32 %s547_s0, 4  ;;  %s371_s24 = int_to_ptr.vmem [resolvable:$true] %s370_s24 }
  0x18   :  { %448 = vmatprep.subr.bf16.mxu0 %v447_v6  ;;  %37 = vst.msk [vmem:[#allocation5] sm:$0x1] %vm36_vm2, %v546_v19  ;;  %s492_s25 = scalar_lea.vmem %s371_s24, 16  ;;  %s496_s26 = scalar_lea.vmem %s371_s24, 32 }
  0x19   :  { %v53_v10 = vadd.f32 %v52_v4, %v51_v7  ;;  %450 = vmatpush3.bf16.msra.mxu0 %v447_v6  ;;  %217 = vrot.lane.b32.xlu0 %v44_v2, %s545_s23  ;;  %p493_p8 = scmp.ne.s32.totalorder %s371_s24, %s492_s25  ;;  %p497_p9 = scmp.lt.s32.totalorder %s371_s24, %s371_s24 }
  0x1a   :  { %221 = vrot.lane.b32.xlu1 %v46_v8, %s545_s23  ;;  %452 = vmatprep.subr.bf16.mxu0 %v451_v12  ;;  %p498_p10 = scmp.lt.s32.totalorder %s496_s26, %s492_s25 }
  0x1b   :  { %v55_v11 = vadd.f32 %v54_v9, %v53_v10 }
  0x1c   :  { %p499_p11 = por %p498_p10, %p497_p9 }
  0x1d   :  { %454 = vmatpush3.bf16.msra.mxu0 %v451_v12  ;;  %v56_v28 = vrot.slane %v55_v11, 4 }
  0x1e   :  { %p500_p12 = pnand %p499_p11, %p493_p8 }
  0x1f   :  { %v57_v29 = vadd.f32 %v56_v28, %v55_v11  ;;  %v47_v34 = vld [vmem:[#allocation5] sm:$0x1] }
  0x21   :  { %v58_v30 = vrot.slane %v57_v29, 2 }
  0x23   :  { %v59_v31 = vadd.f32 %v58_v30, %v57_v29 }
  0x25   :  { %v60_v32 = vrot.slane %v59_v31, 1 }
  0x27   :  { %v61_v33 = vadd.f32 %v60_v32, %v59_v31 }
  0x29   :  { %v62_v35 = vadd.f32 %v61_v33, %v47_v34 }
  0x2b   :  { %64 = vst.msk [vmem:[#allocation5] sm:$0x1] %vm36_vm2, %v62_v35 }
  0x37   :  { %69 = vxpose.xlu0.b32.start [1/4] (short) (narrow) %v43_v0, 32 }
  0x3b   :  { %70 = vxpose.xlu0.b32.cont [2/4] (short) (narrow) %v44_v2, 32 }
  0x3f   :  { %71 = vxpose.xlu0.b32.cont [3/4] (short) (narrow) %v45_v1, 32 }
  0x43   :  { %72 = vxpose.xlu0.b32.end [4/4] (short) (narrow) %v46_v8, 32 }
  0x87   :  { %v216_v13 = vpop.permute.xlu0 %215  ;;  %v220_v14 = vpop.permute.xlu1 %219 }
  0x88   :  { %227 = vxpose.xlu1.b32.start [1/4] (short) (narrow) %v216_v13, 32 }
  0x8b   :  { %v218_v15 = vpop.permute.xlu0 %217 }
  0x8c   :  { %v222_v16 = vpop.permute.xlu1 %221  ;;  %228 = vxpose.xlu1.b32.cont [2/4] (short) (narrow) %v218_v15, 32  ;;  %v455_v17 = vpack.c.bf16 %v218_v15, %v216_v13 }
  0x8d   :  { %v459_v18 = vpack.c.bf16 %v222_v16, %v220_v14 }
  0x8e   :  { %456 = vmatprep.subr.bf16.mxu1 %v455_v17 }
  0x8f   :  { %458 = vmatpush3.bf16.msra.mxu1 %v455_v17 }
  0x90   :  { %229 = vxpose.xlu1.b32.cont [3/4] (short) (narrow) %v220_v14, 32  ;;  %460 = vmatprep.subr.bf16.mxu1 %v459_v18 }
  0x93   :  { %462 = vmatpush3.bf16.msra.mxu1 %v459_v18 }
  0x94   :  { %230 = vxpose.xlu1.b32.end [4/4] (short) (narrow) %v222_v16, 32 }
  0xb7   :  { %v85_v20 = vpop.trf.xlu0 }
  0xb8   :  { %427 = vmatprep.mubr.msk.f32.mxu0 %vm38_vm1, %v85_v20 }
  0xbb   :  { %v86_v21 = vpop.trf.xlu0 }
  0xbc   :  { %428 = vmatmul.mubr.msk.f32.vlgmr.msra.gmra.mrb[0].mxu0 %vm38_vm1, %v86_v21 }
  0xbf   :  { %v87_v22 = vpop.trf.xlu0 }
  0xc0   :  { %430 = vmatprep.mubr.msk.f32.mxu0 %vm38_vm1, %v87_v22 }
  0xc3   :  { %v88_v23 = vpop.trf.xlu0 }
  0xc4   :  { %431 = vmatmul.mubr.msk.f32.gmra.mrb[2].mxu0 %vm38_vm1, %v88_v23 }
 0x108   :  { %v243_v24 = vpop.trf.xlu1 }
 0x109   :  { %441 = vmatprep.mubr.msk.f32.mxu1 %vm38_vm1, %v243_v24 }
 0x10c   :  { %v244_v25 = vpop.trf.xlu1 }
 0x10d   :  { %442 = vmatmul.mubr.msk.f32.vlgmr.msra.gmra.mrb[0].mxu1 %vm38_vm1, %v244_v25 }
 0x110   :  { %v245_v26 = vpop.trf.xlu1 }
 0x111   :  { %444 = vmatprep.mubr.msk.f32.mxu1 %vm38_vm1, %v245_v26 }
 0x114   :  { %v246_v27 = vpop.trf.xlu1 }
 0x115   :  { %445 = vmatmul.mubr.msk.f32.gmra.mrb[2].mxu1 %vm38_vm1, %v246_v27 }
 0x116   :  { %503 = shalt.err (!%p500_p12)
}
 0x117   :  { %s504_s29 = scalar_lea.hbm %s627_s1, 16 }
 0x118   :  { %p505_p13 = scmp.ne.s32.totalorder %s627_s1, %s504_s29  ;;  %p508_p0 = scmp.lt.u32.totalorder %s504_s29, %s627_s1 }
 0x11a   :  { %p510_p1 = pnand %p508_p0, %p505_p13 }
 0x11c   :  { %513 = shalt.err (!%p510_p1)
}
 0x11d   :  { %373 = dma.vmem_to_hbm [thread:$0]  %s371_s24, 16, %s627_s1, [#allocation4]   ;;  %v66_v36 = vld [vmem:[#allocation6 + $0x8] sm:$0xff]  ;;  %v65_v37 = vld [vmem:[#allocation6] sm:$0xff]  ;;  %v68_v42 = vld [vmem:[#allocation6 + $0x18] sm:$0xff] }
 0x11e   :  { %v67_v43 = vld [vmem:[#allocation6 + $0x10] sm:$0xff]  ;;  %s548_s1 = smov [#allocation6]  }
 0x11f   :  { %s379_s8 = sshll.u32 %s548_s1, 4  ;;  %s380_s8 = int_to_ptr.vmem [resolvable:$true] %s379_s8 }
 0x120   :  { %s514_s9 = scalar_lea.vmem %s380_s8, 512  ;;  %p519_p3 = scmp.lt.s32.totalorder %s380_s8, %s380_s8 }
 0x121   :  { %p515_p2 = scmp.ne.s32.totalorder %s380_s8, %s514_s9  ;;  %p520_p4 = scmp.lt.s32.totalorder %s514_s9, %s514_s9 }
 0x123   :  { %p521_p5 = por %p520_p4, %p519_p3 }
 0x125   :  { %p522_p6 = pnand %p521_p5, %p515_p2 }
 0x18f   :  { %v429_v38 = vpop.f32.mrb[0].mxu0 }
 0x190   :  { %v200_v39 = vadd.f32 %v429_v38, %v66_v36  ;;  %v180_v40 = vpop.f32.mrb[1].mxu0 }
 0x191   :  { %v199_v41 = vadd.f32 %v180_v40, %v65_v37 }
 0x192   :  { %204 = vst.msk [vmem:[#allocation6 + $0x8] sm:$0xff] %vm38_vm1, %v200_v39 }
 0x193   :  { %203 = vst.msk [vmem:[#allocation6] sm:$0xff] %vm38_vm1, %v199_v41 }
 0x197   :  { %v432_v44 = vpop.f32.mrb[2].mxu0 }
 0x198   :  { %v202_v45 = vadd.f32 %v432_v44, %v68_v42  ;;  %v190_v46 = vpop.f32.mrb[3].mxu0 }
 0x199   :  { %v201_v47 = vadd.f32 %v190_v46, %v67_v43  ;;  %v208_v48 = vld [vmem:[#allocation6 + $0x8] sm:$0xff] }
 0x19a   :  { %206 = vst.msk [vmem:[#allocation6 + $0x18] sm:$0xff] %vm38_vm1, %v202_v45  ;;  %v207_v49 = vld [vmem:[#allocation6] sm:$0xff] }
 0x19b   :  { %205 = vst.msk [vmem:[#allocation6 + $0x10] sm:$0xff] %vm38_vm1, %v201_v47 }
 0x1a1   :  { %v210_v54 = vld [vmem:[#allocation6 + $0x18] sm:$0xff] }
 0x1a2   :  { %v209_v55 = vld [vmem:[#allocation6 + $0x10] sm:$0xff] }
 0x1e0   :  { %v443_v50 = vpop.f32.mrb[0].mxu1 }
 0x1e1   :  { %v357_v51 = vadd.f32 %v443_v50, %v208_v48  ;;  %v337_v52 = vpop.f32.mrb[1].mxu1 }
 0x1e2   :  { %v356_v53 = vadd.f32 %v337_v52, %v207_v49 }
 0x1e3   :  { %361 = vst.msk [vmem:[#allocation6 + $0x8] sm:$0xff] %vm38_vm1, %v357_v51 }
 0x1e4   :  { %360 = vst.msk [vmem:[#allocation6] sm:$0xff] %vm38_vm1, %v356_v53 }
 0x1e8   :  { %v446_v56 = vpop.f32.mrb[2].mxu1 }
 0x1e9   :  { %v359_v57 = vadd.f32 %v446_v56, %v210_v54  ;;  %v347_v58 = vpop.f32.mrb[3].mxu1 }
 0x1ea   :  { %v358_v59 = vadd.f32 %v347_v58, %v209_v55 }
 0x1eb   :  { %363 = vst.msk [vmem:[#allocation6 + $0x18] sm:$0xff] %vm38_vm1, %v359_v57 }
 0x1ec   :  { %362 = vst.msk [vmem:[#allocation6 + $0x10] sm:$0xff] %vm38_vm1, %v358_v59 }
 0x1ed   :  { %525 = shalt.err (!%p522_p6)
}
 0x1ee   :  { %s526_s12 = scalar_lea.hbm %s628_s2, 512 }
 0x1ef   :  { %p527_p7 = scmp.ne.s32.totalorder %s628_s2, %s526_s12  ;;  %p530_p8 = scmp.lt.u32.totalorder %s526_s12, %s628_s2 }
 0x1f1   :  { %p532_p9 = pnand %p530_p8, %p527_p7 }
 0x1f3   :  { %535 = shalt.err (!%p532_p9)
}
 0x1f4   :  { %385 = dma.vmem_to_hbm [thread:$0]  %s380_s8, 512, %s628_s2, [#allocation7], %s543_s19, %s543_s19, %s544_s20  }
 0x1f5   :  { %538 = dma.done.wait [#allocation4], 16  }
 0x1f6   :  { %539 = vsyncadd [#allocation4], 4294967280 }
 0x1f7   :  { %540 = dma.done.wait [#allocation7], 512  }
 0x1f8   :  { %541 = vsyncadd [#allocation7], 4294966784 }
 0x1f9   :  { %392 = vsyncpa [#allocation3], 1 }
 0x1fa   :  { %393 = vsyncpa [#allocation4], 1 }
 0x1fb   :  { %394 = vsyncpa [#allocation7], 1 }

</bundles_post_ra>
